<compile_context>
chip_gen: v7x
topology: tpu7x:2x2x1
jax: 0.10.0
libtpu: 0.0.40
codegen_flags: <defaults>
</compile_context>

<pallas_src>
import functools
import numpy as np
import jax
import jax.numpy as jnp
from jax.experimental import pallas as pl
from jax.experimental.pallas import tpu as pltpu


# ------------------------------- kernel ------------------------------------ #

def encoder_block_kernel(x_ref, w1_ref, b1_ref, w2_ref, b2_ref, gsel_ref,
                         y_ref, p_ref, *, H, Cout):
    """Fused DoubleConv(3x3, pad=1, ReLU) + MaxPool2d(2,2) for a stack of images.

    Layout: (Mb, W*C) with Mb = images_per_block * H rows stacked on sublanes
    and width*channels lane-dense.  Each conv is one MXU matmul with the three
    kernel rows folded into K; padding rows / cross-image leaks are zeroed via
    iota masks on sublane-rolled operands.
    """
    f32 = jnp.float32
    bf16 = jnp.bfloat16
    Mb = x_ref.shape[0]

    # Row-boundary masks (computed once; depend only on the static Mb, H).
    ridx = jax.lax.broadcasted_iota(jnp.int32, (Mb, 1), 0)
    rmod = ridx % H
    m_first = rmod != 0            # rows whose "row above" is zero padding
    m_last = rmod != (H - 1)       # rows whose "row below" is zero padding

    def conv3x3_relu(a, w_ref, b_ref):
        # a: (Mb, W*Ci) f32 ; w_ref: (3*W*Ci, W*Co) bf16 ; b_ref: (1, W*Co) f32
        # roll lands on the XLU slot, the mask select on the VPU; a single bf16
        # cast of the folded LHS feeds one K = 3*W*Ci MXU pass (f32 accumulate).
        up = jnp.where(m_first, pltpu.roll(a, 1, axis=0), 0.0)        # in[r-1]
        down = jnp.where(m_last, pltpu.roll(a, Mb - 1, axis=0), 0.0)  # in[r+1]
        lhs = jnp.concatenate([up, a, down], axis=1).astype(bf16)
        acc = jnp.dot(lhs, w_ref[...], preferred_element_type=f32)
        return jnp.maximum(acc + b_ref[...], 0.0)                     # bias+ReLU

    a1 = conv3x3_relu(x_ref[...].astype(f32), w1_ref, b1_ref)   # (Mb, W*Cout)
    a2 = conv3x3_relu(a1, w2_ref, b2_ref)                       # (Mb, W*Cout)
    y_ref[...] = a2.astype(y_ref.dtype)                         # lane-dense store

    # ---- fused 2x2 / stride-2 max pool -------------------------------------
    # Row pool: strided-row loads from the just-written VMEM block + VPU max
    # (f32 elementwise -> fine on v5e).  Column pool: lane roll + max, then one
    # exact 0/1 bf16 compaction matmul picking the even column groups.
    even = y_ref[pl.ds(0, Mb // 2, 2), :].astype(f32)
    odd = y_ref[pl.ds(1, Mb // 2, 2), :].astype(f32)
    rows = jnp.maximum(even, odd)                                # (Mb/2, W*Cout)
    wc = rows.shape[1]
    wide = jnp.maximum(rows, pltpu.roll(rows, wc - Cout, axis=1))
    pooled = jnp.dot(wide.astype(bf16), gsel_ref[...],
                     preferred_element_type=f32)                 # (Mb/2, Wh*Cout)
    p_ref[...] = pooled.astype(p_ref.dtype)


# ------------------------ wrapper-side weight prep -------------------------- #

def _band_select(width, dw):
    """(W, W) 0/1 matrix: B[w_in, w_out] = 1 iff w_in == w_out + dw (in range)."""
    b = np.zeros((width, width), np.float32)
    for wo in range(width):
        wi = wo + dw
        if 0 <= wi < width:
            b[wi, wo] = 1.0
    return b


def _folded_banded_weights(w_hwio, width):
    """HWIO (3,3,Ci,Co) -> (3*W*Ci, W*Co) bf16; kh taps stacked along K."""
    mats = []
    for kh in range(3):
        m = None
        for kw in range(3):
            band = jnp.asarray(_band_select(width, kw - 1))
            term = jnp.kron(band, w_hwio[kh, kw].astype(jnp.float32))
            m = term if m is None else m + term
        mats.append(m)
    return jnp.concatenate(mats, axis=0).astype(jnp.bfloat16)


def _pool_col_selector(W, Cout):
    """(W*Cout, Wh*Cout) 0/1 selector picking the even width group (exact in bf16)."""
    Wh = W // 2
    g = np.zeros((W * Cout, Wh * Cout), np.float32)
    for pw in range(Wh):
        for c in range(Cout):
            g[(2 * pw) * Cout + c, pw * Cout + c] = 1.0
    return jnp.asarray(g, jnp.bfloat16)


def _pick_images_per_block(N, H):
    """Stack images to fill the MXU M dim (~256 rows) but keep >=2 grid steps
    when the batch allows, so v7x's second TensorCore has work."""
    ipb = max(1, min(N, max(1, 256 // H)))
    while ipb > 1 and pl.cdiv(N, ipb) < 2:
        ipb -= 1
    while N % ipb:
        ipb -= 1
    return ipb


# ------------------------------ entry point --------------------------------- #

def encoder_block(x_nchw, params):
    """Matches PyTorch EncoderBlock.forward: returns (x, p), both NCHW."""
    N, Cin, H, W = x_nchw.shape
    Cout = params["w1"].shape[-1]
    assert H % 2 == 0 and W % 2 == 0, "MaxPool2d(2,2) path assumes even H, W"
    Hh, Wh = H // 2, W // 2

    ipb = _pick_images_per_block(N, H)
    grid_n = N // ipb
    Mb = ipb * H

    # NCHW -> (N*H, W*Cin): batch*rows on sublanes, width*channels lane-dense.
    # TODO(synk): in a full UNet keep activations in this layout end-to-end so
    # these wrapper transposes (and the output ones) disappear.
    a_in = jnp.transpose(x_nchw, (0, 2, 3, 1)).reshape(N * H, W * Cin)

    w1 = _folded_banded_weights(params["w1"], W)            # (3*W*Cin,  W*Cout)
    w2 = _folded_banded_weights(params["w2"], W)            # (3*W*Cout, W*Cout)
    b1 = jnp.tile(params["b1"], W).reshape(1, W * Cout).astype(jnp.float32)
    b2 = jnp.tile(params["b2"], W).reshape(1, W * Cout).astype(jnp.float32)
    gsel = _pool_col_selector(W, Cout)                      # (W*Cout, Wh*Cout)

    kernel = functools.partial(encoder_block_kernel, H=H, Cout=Cout)

    y_flat, p_flat = pl.pallas_call(
        kernel,
        out_shape=(
            jax.ShapeDtypeStruct((N * H, W * Cout), x_nchw.dtype),
            jax.ShapeDtypeStruct((N * Hh, Wh * Cout), x_nchw.dtype),
        ),
        grid=(grid_n,),
        in_specs=[
            pl.BlockSpec((Mb, W * Cin), lambda g: (g, 0)),
            pl.BlockSpec((3 * W * Cin, W * Cout), lambda g: (0, 0)),
            pl.BlockSpec((1, W * Cout), lambda g: (0, 0)),
            pl.BlockSpec((3 * W * Cout, W * Cout), lambda g: (0, 0)),
            pl.BlockSpec((1, W * Cout), lambda g: (0, 0)),
            pl.BlockSpec((W * Cout, Wh * Cout), lambda g: (0, 0)),
        ],
        out_specs=(
            pl.BlockSpec((Mb, W * Cout), lambda g: (g, 0)),
            pl.BlockSpec((ipb * Hh, Wh * Cout), lambda g: (g, 0)),
        ),
        compiler_params=pltpu.CompilerParams(
            dimension_semantics=("parallel",),
            vmem_limit_bytes=32 * 1024 * 1024,   # sized for v7x's smaller VMEM too
        ),
    )(a_in, w1, b1, w2, b2, gsel)

    x_out = jnp.transpose(y_flat.reshape(N, H, W, Cout), (0, 3, 1, 2))
    p_out = jnp.transpose(p_flat.reshape(N, Hh, Wh, Cout), (0, 3, 1, 2))
    return x_out, p_out


# ------------------------------- reference ---------------------------------- #

def reference(x_nchw, params):
    def conv(x, w, b):
        y = jax.lax.conv_general_dilated(
            x, w, window_strides=(1, 1), padding="SAME",
            dimension_numbers=("NCHW", "HWIO", "NCHW"),
            precision=jax.lax.Precision.HIGHEST)
        return jax.nn.relu(y + b.reshape(1, -1, 1, 1))
    x = conv(x_nchw, params["w1"], params["b1"])
    x = conv(x, params["w2"], params["b2"])
    p = jax.lax.reduce_window(x, -jnp.inf, jax.lax.max,
                              (1, 1, 2, 2), (1, 1, 2, 2), "VALID")
    return x, p


# --------------------------------- main -------------------------------------- #

if __name__ == "__main__":
    key = jax.random.PRNGKey(0)
    kx, k1, k2, k3, k4 = jax.random.split(key, 5)

    N, Cin, Cout, H, W = 2, 4, 8, 16, 16
    x = jax.random.normal(kx, (N, Cin, H, W), jnp.float32)
    # Deterministic synthetic parameters (Conv2d(in, out, 3, padding=1) x 2), HWIO.
    params = {
        "w1": 0.1 * jax.random.normal(k1, (3, 3, Cin, Cout), jnp.float32),
        "b1": 0.1 * jax.random.normal(k2, (Cout,), jnp.float32),
        "w2": 0.1 * jax.random.normal(k3, (3, 3, Cout, Cout), jnp.float32),
        "b2": 0.1 * jax.random.normal(k4, (Cout,), jnp.float32),
    }

    out_x, out_p = jax.jit(encoder_block)(x, params)
    jax.block_until_ready((out_x, out_p))

    assert out_x.shape == (N, Cout, H, W)
    assert out_p.shape == (N, Cout, H // 2, W // 2)

    ref_x, ref_p = reference(x, params)
    np.testing.assert_allclose(np.asarray(out_x), np.asarray(ref_x),
                               rtol=2e-2, atol=2e-2)
    np.testing.assert_allclose(np.asarray(out_p), np.asarray(ref_p),
                               rtol=2e-2, atol=2e-2)
    print("KERNEL_OK")
</pallas_src>

<mosaic_0001>
module attributes {stable_mosaic.version = 11 : i64} {
  func.func @encoder_block_kernel(%arg0: i32, %arg1: memref<16x64xf32, #tpu.memory_space<vmem>>, %arg2: memref<192x128xbf16, #tpu.memory_space<vmem>>, %arg3: memref<1x128xf32, #tpu.memory_space<vmem>>, %arg4: memref<384x128xbf16, #tpu.memory_space<vmem>>, %arg5: memref<1x128xf32, #tpu.memory_space<vmem>>, %arg6: memref<128x64xbf16, #tpu.memory_space<vmem>>, %arg7: memref<16x128xf32, #tpu.memory_space<vmem>>, %arg8: memref<8x64xf32, #tpu.memory_space<vmem>>) attributes {dimension_semantics = [#tpu.dimension_semantics<parallel>], iteration_bounds = array<i64: 2>, scalar_prefetch = 0 : i64, scratch_operands = 0 : i64, tpu.core_type = #tpu.core_type<tc>, window_params = [{transform_indices = @transform_0, window_bounds = array<i64: 16, 64>}, {pipeline_mode = #tpu.pipeline_mode<synchronous>, transform_indices = @transform_1, window_bounds = array<i64: 192, 128>}, {pipeline_mode = #tpu.pipeline_mode<synchronous>, transform_indices = @transform_2, window_bounds = array<i64: 1, 128>}, {pipeline_mode = #tpu.pipeline_mode<synchronous>, transform_indices = @transform_3, window_bounds = array<i64: 384, 128>}, {pipeline_mode = #tpu.pipeline_mode<synchronous>, transform_indices = @transform_4, window_bounds = array<i64: 1, 128>}, {pipeline_mode = #tpu.pipeline_mode<synchronous>, transform_indices = @transform_5, window_bounds = array<i64: 128, 64>}, {transform_indices = @transform_6, window_bounds = array<i64: 16, 128>}, {transform_indices = @transform_7, window_bounds = array<i64: 8, 64>}]} {
    %0 = tpu.iota {dimensions = array<i32: 0>} : vector<16x1xi32>
    %c16_i32 = arith.constant 16 : i32
    %c0_i32 = arith.constant 0 : i32
    %1 = arith.cmpi eq, %c16_i32, %c0_i32 : i32
    %c1_i32 = arith.constant 1 : i32
    %2 = arith.select %1, %c1_i32, %c16_i32 : i32
    %3 = vector.broadcast %2 : i32 to vector<16x1xi32>
    %4 = arith.remsi %0, %3 : vector<16x1xi32>
    %c0_i32_0 = arith.constant 0 : i32
    %5 = vector.broadcast %c0_i32_0 : i32 to vector<16x1xi32>
    %6 = arith.cmpi ne, %4, %5 : vector<16x1xi32>
    %c0_i32_1 = arith.constant 0 : i32
    %7 = vector.broadcast %c0_i32_1 : i32 to vector<16x1xi32>
    %8 = arith.cmpi slt, %4, %7 : vector<16x1xi32>
    %c0_i32_2 = arith.constant 0 : i32
    %9 = arith.cmpi slt, %2, %c0_i32_2 : i32
    %10 = vector.broadcast %9 : i1 to vector<16x1xi1>
    %11 = vector.broadcast %10 : vector<16x1xi1> to vector<16x1xi1>
    %12 = arith.xori %8, %11 : vector<16x1xi1>
    %13 = arith.andi %12, %6 : vector<16x1xi1>
    %14 = vector.broadcast %2 : i32 to vector<16x1xi32>
    %15 = arith.addi %4, %14 : vector<16x1xi32>
    %16 = arith.select %13, %15, %4 : vector<16x1xi1>, vector<16x1xi32>
    %c0_i32_3 = arith.constant 0 : i32
    %17 = vector.broadcast %c0_i32_3 : i32 to vector<16x1xi32>
    %18 = arith.cmpi ne, %16, %17 : vector<16x1xi32>
    %c15_i32 = arith.constant 15 : i32
    %19 = vector.broadcast %c15_i32 : i32 to vector<16x1xi32>
    %20 = arith.cmpi ne, %16, %19 : vector<16x1xi32>
    %c0 = arith.constant 0 : index
    %c0_4 = arith.constant 0 : index
    %21 = vector.load %arg1[%c0, %c0_4] : memref<16x64xf32, #tpu.memory_space<vmem>>, vector<16x64xf32>
    %c1_i32_5 = arith.constant 1 : i32
    %22 = tpu.dynamic_rotate %21 by %c1_i32_5 dim 0 : vector<16x64xf32>, i32 -> vector<16x64xf32>
    %cst = arith.constant 0.000000e+00 : f32
    %23 = vector.shape_cast %18 : vector<16x1xi1> to vector<16x1xi1>
    %24 = vector.broadcast %23 : vector<16x1xi1> to vector<16x64xi1>
    %25 = vector.broadcast %cst : f32 to vector<16x64xf32>
    %26 = arith.select %24, %22, %25 : vector<16x64xi1>, vector<16x64xf32>
    %c15_i32_6 = arith.constant 15 : i32
    %27 = tpu.dynamic_rotate %21 by %c15_i32_6 dim 0 : vector<16x64xf32>, i32 -> vector<16x64xf32>
    %cst_7 = arith.constant 0.000000e+00 : f32
    %28 = vector.shape_cast %20 : vector<16x1xi1> to vector<16x1xi1>
    %29 = vector.broadcast %28 : vector<16x1xi1> to vector<16x64xi1>
    %30 = vector.broadcast %cst_7 : f32 to vector<16x64xf32>
    %31 = arith.select %29, %27, %30 : vector<16x64xi1>, vector<16x64xf32>
    %32 = tpu.concatenate %26, %21, %31 in 1 : vector<16x64xf32>, vector<16x64xf32>, vector<16x64xf32> -> vector<16x192xf32>
    %33 = arith.truncf %32 : vector<16x192xf32> to vector<16x192xbf16>
    %c0_8 = arith.constant 0 : index
    %c0_9 = arith.constant 0 : index
    %34 = vector.load %arg2[%c0_8, %c0_9] : memref<192x128xbf16, #tpu.memory_space<vmem>>, vector<192x128xbf16>
    %cst_10 = arith.constant dense<0.000000e+00> : vector<16x128xf32>
    %35 = tpu.matmul %33, %34, %cst_10 {dimension_numbers = #tpu.dot_dimension_numbers<[1], [0], [0], [1], [0, 0, 1, 1], [], []>} : vector<16x192xbf16>, vector<192x128xbf16>, vector<16x128xf32> -> vector<16x128xf32>
    %c0_11 = arith.constant 0 : index
    %c0_12 = arith.constant 0 : index
    %36 = vector.load %arg3[%c0_11, %c0_12] : memref<1x128xf32, #tpu.memory_space<vmem>>, vector<1x128xf32>
    %37 = vector.broadcast %36 : vector<1x128xf32> to vector<16x128xf32>
    %38 = arith.addf %35, %37 : vector<16x128xf32>
    %cst_13 = arith.constant 0.000000e+00 : f32
    %39 = vector.broadcast %cst_13 : f32 to vector<16x128xf32>
    %40 = arith.maximumf %38, %39 : vector<16x128xf32>
    %c1_i32_14 = arith.constant 1 : i32
    %41 = tpu.dynamic_rotate %40 by %c1_i32_14 dim 0 : vector<16x128xf32>, i32 -> vector<16x128xf32>
    %cst_15 = arith.constant 0.000000e+00 : f32
    %42 = vector.shape_cast %18 : vector<16x1xi1> to vector<16x1xi1>
    %43 = vector.broadcast %42 : vector<16x1xi1> to vector<16x128xi1>
    %44 = vector.broadcast %cst_15 : f32 to vector<16x128xf32>
    %45 = arith.select %43, %41, %44 : vector<16x128xi1>, vector<16x128xf32>
    %c15_i32_16 = arith.constant 15 : i32
    %46 = tpu.dynamic_rotate %40 by %c15_i32_16 dim 0 : vector<16x128xf32>, i32 -> vector<16x128xf32>
    %cst_17 = arith.constant 0.000000e+00 : f32
    %47 = vector.shape_cast %20 : vector<16x1xi1> to vector<16x1xi1>
    %48 = vector.broadcast %47 : vector<16x1xi1> to vector<16x128xi1>
    %49 = vector.broadcast %cst_17 : f32 to vector<16x128xf32>
    %50 = arith.select %48, %46, %49 : vector<16x128xi1>, vector<16x128xf32>
    %51 = tpu.concatenate %45, %40, %50 in 1 : vector<16x128xf32>, vector<16x128xf32>, vector<16x128xf32> -> vector<16x384xf32>
    %52 = arith.truncf %51 : vector<16x384xf32> to vector<16x384xbf16>
    %c0_18 = arith.constant 0 : index
    %c0_19 = arith.constant 0 : index
    %53 = vector.load %arg4[%c0_18, %c0_19] : memref<384x128xbf16, #tpu.memory_space<vmem>>, vector<384x128xbf16>
    %cst_20 = arith.constant dense<0.000000e+00> : vector<16x128xf32>
    %54 = tpu.matmul %52, %53, %cst_20 {dimension_numbers = #tpu.dot_dimension_numbers<[1], [0], [0], [1], [0, 0, 1, 1], [], []>} : vector<16x384xbf16>, vector<384x128xbf16>, vector<16x128xf32> -> vector<16x128xf32>
    %c0_21 = arith.constant 0 : index
    %c0_22 = arith.constant 0 : index
    %55 = vector.load %arg5[%c0_21, %c0_22] : memref<1x128xf32, #tpu.memory_space<vmem>>, vector<1x128xf32>
    %56 = vector.broadcast %55 : vector<1x128xf32> to vector<16x128xf32>
    %57 = arith.addf %54, %56 : vector<16x128xf32>
    %cst_23 = arith.constant 0.000000e+00 : f32
    %58 = vector.broadcast %cst_23 : f32 to vector<16x128xf32>
    %59 = arith.maximumf %57, %58 : vector<16x128xf32>
    %c0_24 = arith.constant 0 : index
    %c0_25 = arith.constant 0 : index
    %60 = vector.load %arg7[%c0_24, %c0_25] : memref<16x128xf32, #tpu.memory_space<vmem>>, vector<16x128xf32>
    tpu.vector_store %arg7[%c0_24, %c0_25], %59 {strides = array<i32>} : memref<16x128xf32, #tpu.memory_space<vmem>>, vector<16x128xf32>,
    %c0_26 = arith.constant 0 : index
    %c0_27 = arith.constant 0 : index
    %61 = tpu.strided_load %arg7[%c0_26, %c0_27] {strides = array<i32: 2, 1>} : memref<16x128xf32, #tpu.memory_space<vmem>>, vector<8x128xf32>
    %c1 = arith.constant 1 : index
    %c0_28 = arith.constant 0 : index
    %62 = tpu.strided_load %arg7[%c1, %c0_28] {strides = array<i32: 2, 1>} : memref<16x128xf32, #tpu.memory_space<vmem>>, vector<8x128xf32>
    %63 = arith.maximumf %61, %62 : vector<8x128xf32>
    %c120_i32 = arith.constant 120 : i32
    %64 = tpu.dynamic_rotate %63 by %c120_i32 dim 1 : vector<8x128xf32>, i32 -> vector<8x128xf32>
    %65 = arith.maximumf %63, %64 : vector<8x128xf32>
    %66 = arith.truncf %65 : vector<8x128xf32> to vector<8x128xbf16>
    %c0_29 = arith.constant 0 : index
    %c0_30 = arith.constant 0 : index
    %67 = vector.load %arg6[%c0_29, %c0_30] : memref<128x64xbf16, #tpu.memory_space<vmem>>, vector<128x64xbf16>
    %cst_31 = arith.constant dense<0.000000e+00> : vector<8x64xf32>
    %68 = tpu.matmul %66, %67, %cst_31 {dimension_numbers = #tpu.dot_dimension_numbers<[1], [0], [0], [1], [0, 0, 1, 1], [], []>} : vector<8x128xbf16>, vector<128x64xbf16>, vector<8x64xf32> -> vector<8x64xf32>
    %c0_32 = arith.constant 0 : index
    %c0_33 = arith.constant 0 : index
    %69 = vector.load %arg8[%c0_32, %c0_33] : memref<8x64xf32, #tpu.memory_space<vmem>>, vector<8x64xf32>
    tpu.vector_store %arg8[%c0_32, %c0_33], %68 {strides = array<i32>} : memref<8x64xf32, #tpu.memory_space<vmem>>, vector<8x64xf32>,
    return
  }
  func.func @transform_0(%arg0: i32) -> (i32, i32) {
    %c0_i32 = arith.constant 0 : i32
    %c0_i32_0 = arith.constant 0 : i32
    return %arg0, %c0_i32 : i32, i32
  }
  func.func @transform_1(%arg0: i32) -> (i32, i32) {
    %c0_i32 = arith.constant 0 : i32
    %c0_i32_0 = arith.constant 0 : i32
    %c0_i32_1 = arith.constant 0 : i32
    return %c0_i32, %c0_i32_0 : i32, i32
  }
  func.func @transform_2(%arg0: i32) -> (i32, i32) {
    %c0_i32 = arith.constant 0 : i32
    %c0_i32_0 = arith.constant 0 : i32
    %c0_i32_1 = arith.constant 0 : i32
    return %c0_i32, %c0_i32_0 : i32, i32
  }
  func.func @transform_3(%arg0: i32) -> (i32, i32) {
    %c0_i32 = arith.constant 0 : i32
    %c0_i32_0 = arith.constant 0 : i32
    %c0_i32_1 = arith.constant 0 : i32
    return %c0_i32, %c0_i32_0 : i32, i32
  }
  func.func @transform_4(%arg0: i32) -> (i32, i32) {
    %c0_i32 = arith.constant 0 : i32
    %c0_i32_0 = arith.constant 0 : i32
    %c0_i32_1 = arith.constant 0 : i32
    return %c0_i32, %c0_i32_0 : i32, i32
  }
  func.func @transform_5(%arg0: i32) -> (i32, i32) {
    %c0_i32 = arith.constant 0 : i32
    %c0_i32_0 = arith.constant 0 : i32
    %c0_i32_1 = arith.constant 0 : i32
    return %c0_i32, %c0_i32_0 : i32, i32
  }
  func.func @transform_6(%arg0: i32) -> (i32, i32) {
    %c0_i32 = arith.constant 0 : i32
    %c0_i32_0 = arith.constant 0 : i32
    return %arg0, %c0_i32 : i32, i32
  }
  func.func @transform_7(%arg0: i32) -> (i32, i32) {
    %c0_i32 = arith.constant 0 : i32
    %c0_i32_0 = arith.constant 0 : i32
    return %arg0, %c0_i32 : i32, i32
  }
}

</mosaic_0001>

<bundles_post_ra>
// kernel: tile.13
= control target key start
LH: loop header
LB: loop body
LE: loop exit
PB: predicated region body
PF: predicated region fallthrough
CT: control target
= control target key end

     0   :  { %s28_s0 = inlined_call_operand.vmem [shape: f32[8], index: 0, kind: input, shape index: {}]   ;;  %s29_s1 = inlined_call_operand.vmem [shape: f32[16,8], index: 1, kind: output, shape index: {}]  }
   0x1   :  { %v4_v0 = vld [vmem:[%s28_s0] ss:$0 sm:$0xff] }
   0x2   :  { %5 = vst [vmem:[%s29_s1] sm:$0xff] %v4_v0  ;;  %8 = vst [vmem:[%s29_s1 + $0x8] sm:$0xff] %v4_v0 }

// kernel: tile.14
= control target key start
LH: loop header
LB: loop body
LE: loop exit
PB: predicated region body
PF: predicated region fallthrough
CT: control target
= control target key end

     0   :  { %s131_s10 = smov 120   ;;  %s132_s11 = smov 104   ;;  %vm3_vm0 = vcmask 64512   ;;  %vm9_vm1 = vcmask 1048512   ;;  %vm15_vm2 = vcmask 982912   ;;  %vm21_vm3 = vcmask 917312   ;;  %s207_s0 = inlined_call_operand.vmem [shape: f32[16,8], index: 0, kind: input, shape index: {}]   ;;  %s208_s1 = inlined_call_operand.vmem [shape: f32[1,128], index: 1, kind: output, shape index: {}]  }
   0x1   :  { %v101_v0 = vld [vmem:[%s207_s0 + $0xf] sm:$0x1]   ;;  %v103_v1 = vld [vmem:[%s207_s0 + $0xd] sm:$0x1]   ;;  %v102_v2 = vld [vmem:[%s207_s0 + $0xe] sm:$0x1]  }
   0x2   :  { %7 = vrot.lane.b32.xlu0 %v101_v0, %s131_s10  ;;  %19 = vrot.lane.b32.xlu1 %v103_v1, %s132_s11  ;;  %v104_v3 = vld [vmem:[%s207_s0 + $0xc] sm:$0x1]   ;;  %s133_s16 = smov 112   ;;  %s134_s17 = smov 96   ;;  %v105_v4 = vld [vmem:[%s207_s0 + $0xb] sm:$0x1]  }
   0x3   :  { %v106_v5 = vld [vmem:[%s207_s0 + $0xa] sm:$0x1]   ;;  %v2_v6 = vld [vmem:[%s207_s0] sm:$0x1]   ;;  %s135_s24 = smov 88   ;;  %s136_s25 = smov 80  }
   0x4   :  { %4 = vst.msk [vmem:[#allocation0] sm:$0x1] %vm3_vm0, %v2_v6   ;;  %v107_v7 = vld [vmem:[%s207_s0 + $0x9] sm:$0x1]   ;;  %v108_v8 = vld [vmem:[%s207_s0 + $0x8] sm:$0x1]  }
   0x5   :  { %s137_s30 = smov 72   ;;  %s138_s2 = smov 64   ;;  %v109_v9 = vld [vmem:[%s207_s0 + $0x7] sm:$0x1]   ;;  %v110_v10 = vld [vmem:[%s207_s0 + $0x6] sm:$0x1]  }
   0x6   :  { %13 = vrot.lane.b32.xlu0 %v102_v2, %s133_s16  ;;  %25 = vrot.lane.b32.xlu1 %v104_v3, %s134_s17  ;;  %s139_s7 = smov 56   ;;  %s140_s8 = smov 48   ;;  %v111_v11 = vld [vmem:[%s207_s0 + $0x5] sm:$0x1]   ;;  %v112_v12 = vld [vmem:[%s207_s0 + $0x4] sm:$0x1]  }
   0x7   :  { %s141_s13 = smov 40   ;;  %s142_s14 = smov 32   ;;  %v113_v13 = vld [vmem:[%s207_s0 + $0x3] sm:$0x1]   ;;  %v114_v14 = vld [vmem:[%s207_s0 + $0x2] sm:$0x1]  }
   0x8   :  { %s143_s19 = smov 24   ;;  %s144_s20 = smov 16   ;;  %v115_v15 = vld [vmem:[%s207_s0 + $0x1] sm:$0x1]   ;;  %vm27_vm4 = vcmask 851712   ;;  %vm33_vm5 = vcmask 786112  }
   0x9   :  { %s145_s0 = smov 8   ;;  %vm39_vm6 = vcmask 720512   ;;  %vm45_vm7 = vcmask 654912   ;;  %vm51_vm8 = vcmask 589312   ;;  %vm57_vm9 = vcmask 523712  }
   0xa   :  { %31 = vrot.lane.b32.xlu0 %v105_v4, %s135_s24  ;;  %37 = vrot.lane.b32.xlu1 %v106_v5, %s136_s25  ;;  %vm63_vm10 = vcmask 458112   ;;  %vm69_vm11 = vcmask 392512   ;;  %vm75_vm12 = vcmask 326912   ;;  %vm81_vm13 = vcmask 261312  }
   0xb   :  { %vm87_vm14 = vcmask 195712   ;;  %vm93_vm15 = vcmask 130112  }
   0xe   :  { %43 = vrot.lane.b32.xlu0 %v107_v7, %s137_s30  ;;  %49 = vrot.lane.b32.xlu1 %v108_v8, %s138_s2 }
  0x12   :  { %55 = vrot.lane.b32.xlu0 %v109_v9, %s139_s7  ;;  %61 = vrot.lane.b32.xlu1 %v110_v10, %s140_s8 }
  0x16   :  { %67 = vrot.lane.b32.xlu0 %v111_v11, %s141_s13  ;;  %73 = vrot.lane.b32.xlu1 %v112_v12, %s142_s14 }
  0x1a   :  { %79 = vrot.lane.b32.xlu0 %v113_v13, %s143_s19  ;;  %85 = vrot.lane.b32.xlu1 %v114_v14, %s144_s20 }
  0x1e   :  { %91 = vrot.lane.b32.xlu0 %v115_v15, %s145_s0 }
  0x74   :  { %v8_v16 = vpop.permute.xlu0 %7   ;;  %v20_v17 = vpop.permute.xlu1 %19  }
  0x75   :  { %10 = vst.msk [vmem:[#allocation0] sm:$0x1] %vm9_vm1, %v8_v16  }
  0x78   :  { %v14_v18 = vpop.permute.xlu0 %13   ;;  %v26_v19 = vpop.permute.xlu1 %25  }
  0x79   :  { %16 = vst.msk [vmem:[#allocation0] sm:$0x1] %vm15_vm2, %v14_v18  }
  0x7a   :  { %22 = vst.msk [vmem:[#allocation0] sm:$0x1] %vm21_vm3, %v20_v17  }
  0x7b   :  { %28 = vst.msk [vmem:[#allocation0] sm:$0x1] %vm27_vm4, %v26_v19  }
  0x7c   :  { %v32_v20 = vpop.permute.xlu0 %31   ;;  %v38_v21 = vpop.permute.xlu1 %37  }
  0x7d   :  { %34 = vst.msk [vmem:[#allocation0] sm:$0x1] %vm33_vm5, %v32_v20  }
  0x7e   :  { %40 = vst.msk [vmem:[#allocation0] sm:$0x1] %vm39_vm6, %v38_v21  }
  0x80   :  { %v44_v22 = vpop.permute.xlu0 %43   ;;  %v50_v23 = vpop.permute.xlu1 %49  }
  0x81   :  { %46 = vst.msk [vmem:[#allocation0] sm:$0x1] %vm45_vm7, %v44_v22  }
  0x82   :  { %52 = vst.msk [vmem:[#allocation0] sm:$0x1] %vm51_vm8, %v50_v23  }
  0x84   :  { %v56_v24 = vpop.permute.xlu0 %55   ;;  %v62_v25 = vpop.permute.xlu1 %61  }
  0x85   :  { %58 = vst.msk [vmem:[#allocation0] sm:$0x1] %vm57_vm9, %v56_v24  }
  0x86   :  { %64 = vst.msk [vmem:[#allocation0] sm:$0x1] %vm63_vm10, %v62_v25  }
  0x88   :  { %v68_v26 = vpop.permute.xlu0 %67   ;;  %v74_v27 = vpop.permute.xlu1 %73  }
  0x89   :  { %70 = vst.msk [vmem:[#allocation0] sm:$0x1] %vm69_vm11, %v68_v26  }
  0x8a   :  { %76 = vst.msk [vmem:[#allocation0] sm:$0x1] %vm75_vm12, %v74_v27  }
  0x8c   :  { %v80_v28 = vpop.permute.xlu0 %79   ;;  %v86_v29 = vpop.permute.xlu1 %85  }
  0x8d   :  { %82 = vst.msk [vmem:[#allocation0] sm:$0x1] %vm81_vm13, %v80_v28  }
  0x8e   :  { %88 = vst.msk [vmem:[#allocation0] sm:$0x1] %vm87_vm14, %v86_v29  }
  0x90   :  { %v92_v30 = vpop.permute.xlu0 %91  }
  0x91   :  { %94 = vst.msk [vmem:[#allocation0] sm:$0x1] %vm93_vm15, %v92_v30  }
  0x98   :  { %v98_v31 = vld [vmem:[#allocation0] sm:$0x1] }
  0x99   :  { %100 = vst [vmem:[%s208_s1] sm:$0x1] %v98_v31 }

// kernel: encoder_block.1
= control target key start
LH: loop header
LB: loop body
LE: loop exit
PB: predicated region body
PF: predicated region fallthrough
CT: control target
= control target key end

     0   :  { %s1274_s24 = smov 0   ;;  %s1520_s0 = inlined_call_operand.vmem [shape: f32[32,64], index: 0, kind: input, shape index: {}]   ;;  %s1521_s1 = inlined_call_operand.vmem [shape: bf16[192,128], index: 1, kind: input, shape index: {}]   ;;  %s1522_s2 = inlined_call_operand.vmem [shape: f32[1,128], index: 2, kind: input, shape index: {}]   ;;  %s1523_s3 = inlined_call_operand.vmem [shape: bf16[384,128], index: 3, kind: input, shape index: {}]   ;;  %s1524_s4 = inlined_call_operand.vmem [shape: f32[1,128], index: 4, kind: input, shape index: {}]   ;;  %s1525_s5 = inlined_call_operand.vmem [shape: bf16[128,64], index: 5, kind: input, shape index: {}]   ;;  %s1526_s6 = inlined_call_operand.vmem [shape: f32[32,128], index: 6, kind: output, shape index: {0}]   ;;  %s1527_s7 = inlined_call_operand.vmem [shape: f32[16,64], index: 7, kind: output, shape index: {1}]  }
   0x1 LB: > { %s1280_s25 = sadd.s32 4294967295, %s1226_s24   ;;  %p1015_p0 = scmp.ge.s32.totalorder %s1226_s24, 1  ;;  %s1226_s24 = sphi %s1274_s24, %s18_s24  }
   0x2   : > { %p241_p1 = scmp.lt.s32.totalorder %s1226_s24, 3 }
   0x4   : > { %p242_p2 = pnand %p1015_p0, %p241_p1 }
   0x5   : > { %s1016_s26 = sshll.u32 (!%p242_p2), %s1280_s25, 1  ;;  %v1176_v0 = vld [vmem:[%s1521_s1] sm:$0xff] (!%p242_p2)   ;;  %v294_v1 = vlaneseq (!%p242_p2)  ;;  %v1228_v2 = vmov (!%p242_p2), 0   ;;  %v1177_v3 = vld [vmem:[%s1521_s1 + $0x8] sm:$0xff] (!%p242_p2)   ;;  %v1178_v5 = vld [vmem:[%s1521_s1 + $0x10] sm:$0xff] (!%p242_p2)   ;;  %s1229_s16 = smov (!%p242_p2), 64  }
   0x6   : > { %245 = sbr.rel (%p242_p2) target bundleno = 956 (0x3bc), region = 44  ;;  %p278_p3 = scmp.lt.s32.totalorder (!%p242_p2), %s1016_s26, 3  ;;  %468 = vmatprep.subr.bf16.mxu0 (!%p242_p2), %v1228_v2  ;;  %v1179_v12 = vld [vmem:[%s1521_s1 + $0x18] sm:$0xff] (!%p242_p2)   ;;  %v1188_v19 = vld [vmem:[%s1523_s3 + $0x40] sm:$0xff] (!%p242_p2)   ;;  %v1181_v26 = vld [vmem:[%s1521_s1 + $0x28] sm:$0xff] (!%p242_p2)   ;;  %vm357_vm3 = vcmask (!%p242_p2), 523264  }
   0x7   : > { %469 = vmatpush1.bf16.msra.mxu0 (!%p242_p2), %v1176_v0  ;;  %v1295_v4 = vshrl.u32 (!%p242_p2), %v294_v1, 7  ;;  %v1180_v20 = vld [vmem:[%s1521_s1 + $0x20] sm:$0xff] (!%p242_p2)   ;;  %1077 = vmatprep.subr.bf16.mxu1 (!%p242_p2), %v1188_v19  ;;  %v1190_v27 = vld [vmem:[%s1523_s3 + $0x48] sm:$0xff] (!%p242_p2)   ;;  %v1192_v29 = vld [vmem:[%s1523_s3 + $0x50] sm:$0xff] (!%p242_p2)   ;;  %v1230_v56 = vmov (!%p242_p2), 0.0   ;;  %vm1231_vm5 = vmmov (!%p242_p2), 0  }
   0x8   : > { %470 = vmatprep.subr.bf16.mxu0 (!%p242_p2), %v1228_v2  ;;  %v1189_v25 = vld [vmem:[%s1523_s3] sm:$0xff] (!%p242_p2)   ;;  %v1191_v28 = vld [vmem:[%s1523_s3 + $0x8] sm:$0xff] (!%p242_p2)   ;;  %v1182_v30 = vld [vmem:[%s1521_s1 + $0x30] sm:$0xff] (!%p242_p2)   ;;  %vm1232_vm6 = vmmov (!%p242_p2), 1   ;;  %p289_p4 = scmp.lt.s32.totalorder (!%p242_p2), %s1280_s25, 1 }
   0x9   : > { %v296_v8 = vadd.s32 (!%p242_p2), 8, %v1295_v4  ;;  %vm340_vm0 = vcmp.lt.s32.totalorder (!%p242_p2), %v1295_v4, 7  ;;  %vm329_vm2 = vcmp.lt.s32.totalorder (!%p242_p2), %v1295_v4, 1  ;;  %1078 = vmatpush3.bf16.msra.mxu1 (!%p242_p2), %v1189_v25  ;;  %v1193_v31 = vld [vmem:[%s1523_s3 + $0x10] sm:$0xff] (!%p242_p2)   ;;  %v1194_v32 = vld [vmem:[%s1523_s3 + $0x58] sm:$0xff] (!%p242_p2)   ;;  %v1196_v35 = vld [vmem:[%s1523_s3 + $0x60] sm:$0xff] (!%p242_p2)  }
   0xa   : > { %1079 = vmatprep.subr.bf16.mxu1 (!%p242_p2), %v1190_v27  ;;  %v1183_v33 = vld [vmem:[%s1521_s1 + $0x38] sm:$0xff] (!%p242_p2)   ;;  %v1197_v36 = vld [vmem:[%s1523_s3 + $0x20] sm:$0xff] (!%p242_p2)   ;;  %v1198_v38 = vld [vmem:[%s1523_s3 + $0x68] sm:$0xff] (!%p242_p2)   ;;  %v301_v42 = vand.u32 (!%p242_p2), 15, %v1295_v4 }
   0xb   : > { %471 = vmatpush1.bf16.msra.mxu0 (!%p242_p2), %v1177_v3  ;;  %v308_v15 = vand.u32 (!%p242_p2), 15, %v296_v8  ;;  %v1195_v34 = vld [vmem:[%s1523_s3 + $0x18] sm:$0xff] (!%p242_p2)   ;;  %v1184_v37 = vld [vmem:[%s1521_s1 + $0x40] sm:$0xff] (!%p242_p2)   ;;  %v1185_v39 = vld [vmem:[%s1521_s1 + $0x48] sm:$0xff] (!%p242_p2)  }
   0xc   : > { %472 = vmatprep.subr.bf16.mxu0 (!%p242_p2), %v1228_v2  ;;  %v1186_v40 = vld [vmem:[%s1521_s1 + $0x50] sm:$0xff] (!%p242_p2)   ;;  %v1187_v41 = vld [vmem:[%s1521_s1 + $0x58] sm:$0xff] (!%p242_p2)   ;;  %vm1395_vm4 = vcmp.ne.s32.totalorder (!%p242_p2), %v301_v42, 0  ;;  %v1199_v51 = vld [vmem:[%s1523_s3 + $0x28] sm:$0xff] (!%p242_p2)  }
   0xd   : > { %s1533_s26 = smov (!%p278_p3, %s1016_s26), 3  ;;  %vm1317_vm1 = vcmp.ne.s32.totalorder %v308_v15, 15  ;;  %1080 = vmatpush3.bf16.msra.mxu1 %v1191_v28  ;;  %v1200_v52 = vld [vmem:[%s1523_s3 + $0x70] sm:$0xff]   ;;  %v1202_v54 = vld [vmem:[%s1523_s3 + $0x78] sm:$0xff]   ;;  %v1021_v57 = vld [vmem:[%s1522_s2] ss:$0 sm:$0xff] }
   0xe   : > { %s1017_s8 = sshll.u32 %s1533_s26, 3  ;;  %1081 = vmatprep.subr.bf16.mxu1 %v1192_v29  ;;  %v1201_v53 = vld [vmem:[%s1523_s3 + $0x30] sm:$0xff]   ;;  %v1203_v55 = vld [vmem:[%s1523_s3 + $0x38] sm:$0xff]   ;;  %vm1060_vm7 = vmpackc.low %vm1232_vm6, %vm1395_vm4  ;;  %s1233_s26 = smov 120  }
   0xf   : > { %s281_s11 = scalar_lea.vmem %s1520_s0, %s1017_s8  ;;  %473 = vmatpush1.bf16.msra.mxu0 %v1178_v5  ;;  %v1205_v15 = vld [vmem:[%s1523_s3 + $0x88] sm:$0xff]   ;;  %v1206_v4 = vld [vmem:[%s1523_s3 + $0x90] sm:$0xff]   ;;  %vm1063_vm8 = vmpackc.low %vm1317_vm1, %vm1232_vm6  ;;  %s287_s28 = scalar_lea.vmem %s1526_s6, %s1017_s8 }
  0x10   : > { %v325_v6 = vld [vmem:[%s281_s11] sm:$0xff]  ;;  %v326_v7 = vld [vmem:[%s281_s11 + $0x8] sm:$0xff]  ;;  %474 = vmatprep.subr.bf16.mxu0 %v1228_v2  ;;  %v1215_v18 = vld [vmem:[%s1525_s5 + $0x18] sm:$0xff]   ;;  %s1535_s25 = smov (!%p289_p4, %s1280_s25), 1 }
  0x11   : > { %v328_v9 = vrot.slane %v326_v7, 7  ;;  %v339_v10 = vrot.slane %v326_v7, 1  ;;  %v1171_v11 = vpack.i.bf16 %v326_v7, %v325_v6  ;;  %v327_v13 = vrot.slane %v325_v6, 7  ;;  %1082 = vmatpush3.bf16.msra.mxu1 %v1193_v31  ;;  %v1209_v19 = vld [vmem:[%s1523_s3 + $0xa8] sm:$0xff]   ;;  %v1216_v25 = vld [vmem:[%s1525_s5 + $0x20] sm:$0xff]   ;;  %v1218_v27 = vld [vmem:[%s1525_s5 + $0x30] sm:$0xff]  }
  0x12   : > { %v338_v14 = vrot.slane %v325_v6, 1  ;;  %1083 = vmatprep.subr.bf16.mxu1 %v1194_v32  ;;  %s1020_s8 = sshll.u32 %s1535_s25, 3 }
  0x13   : > { %1172 = vrot.lane.b32.xlu0 %v1171_v11, %s1229_s16  ;;  %475 = vmatpush1.bf16.msra.mxu0 %v1179_v12  ;;  %v330_v22 = vsel %vm329_vm2, %v327_v13, %v328_v9  ;;  %v331_v23 = vsel %vm329_vm2, %v328_v9, %v327_v13  ;;  %v1204_v12 = vld [vmem:[%s1523_s3 + $0x80] sm:$0xff]   ;;  %s292_s11 = scalar_lea.vmem %s1527_s7, %s1020_s8 }
  0x14   : > { %v342_v16 = vsel %vm340_vm0, %v339_v10, %v338_v14  ;;  %v341_v17 = vsel %vm340_vm0, %v338_v14, %v339_v10  ;;  %476 = vmatprep.subr.bf16.mxu0 %v1228_v2  ;;  %v336_v45 = vsel %vm1395_vm4, %v331_v23, 0.0  ;;  %v1213_v23 = vld [vmem:[%s1525_s5 + $0x8] sm:$0xff]  }
  0x15   : > { %v348_v21 = vsel %vm1317_vm1, %v342_v16, 0.0  ;;  %1084 = vmatpush3.bf16.msra.mxu1 %v1195_v34  ;;  %v1207_v16 = vld [vmem:[%s1523_s3 + $0x98] sm:$0xff]   ;;  %v1035_v34 = vld [vmem:[%s1524_s4] ss:$0 sm:$0xff] }
  0x16   : > { %v361_v24 = vpack.c.bf16 %v348_v21, %v341_v17  ;;  %1085 = vmatprep.subr.bf16.mxu1 %v1196_v35  ;;  %v1208_v17 = vld [vmem:[%s1523_s3 + $0xa0] sm:$0xff]   ;;  %v1211_v21 = vld [vmem:[%s1523_s3 + $0xb8] sm:$0xff]  }
  0x17   : > { %477 = vmatpush1.bf16.msra.mxu0 %v1180_v20  ;;  %v1210_v20 = vld [vmem:[%s1523_s3 + $0xb0] sm:$0xff]  }
  0x18   : > { %1034 = vmatprep.mubr.msk.bf16.mxu0 %vm357_vm3, %v361_v24  ;;  %478 = vmatprep.subr.bf16.mxu0 %v1228_v2  ;;  %v1214_v24 = vld [vmem:[%s1525_s5 + $0x10] sm:$0xff]  }
  0x19   : > { %1086 = vmatpush3.bf16.msra.mxu1 %v1197_v36 }
  0x1a   : > { %1087 = vmatprep.subr.bf16.mxu1 %v1198_v38 }
  0x1b   : > { %479 = vmatpush1.bf16.msra.mxu0 %v1181_v26  ;;  %v1217_v26 = vld [vmem:[%s1525_s5 + $0x28] sm:$0xff]  }
  0x1c   : > { %480 = vmatprep.subr.bf16.mxu0 %v1228_v2 }
  0x1d   : > { %1088 = vmatpush3.bf16.msra.mxu1 %v1199_v51 }
  0x1e   : > { %1089 = vmatprep.subr.bf16.mxu1 %v1200_v52 }
  0x1f   : > { %481 = vmatpush1.bf16.msra.mxu0 %v1182_v30 }
  0x20   : > { %482 = vmatprep.subr.bf16.mxu0 %v1228_v2 }
  0x21   : > { %1090 = vmatpush3.bf16.msra.mxu1 %v1201_v53 }
  0x22   : > { %1091 = vmatprep.subr.bf16.mxu1 %v1202_v54 }
  0x23   : > { %483 = vmatpush1.bf16.msra.mxu0 %v1183_v33 }
  0x24   : > { %484 = vmatprep.subr.bf16.mxu0 %v1228_v2 }
  0x25   : > { %1092 = vmatpush3.bf16.msra.mxu1 %v1203_v55 }
  0x26   : > { %1117 = vmatprep.subr.bf16.mxu1 %v1230_v56 }
  0x27   : > { %485 = vmatpush1.bf16.msra.mxu0 %v1184_v37 }
  0x28   : > { %486 = vmatprep.subr.bf16.mxu0 %v1228_v2 }
  0x2b   : > { %487 = vmatpush1.bf16.msra.mxu0 %v1185_v39 }
  0x2c   : > { %488 = vmatprep.subr.bf16.mxu0 %v1228_v2 }
  0x2f   : > { %489 = vmatpush1.bf16.msra.mxu0 %v1186_v40 }
  0x30   : > { %490 = vmatprep.subr.bf16.mxu0 %v1228_v2 }
  0x33   : > { %491 = vmatpush1.bf16.msra.mxu0 %v1187_v41 }
  0x34   : > { %1137 = vmatprep.subr.bf16.mxu0 %v1230_v56 }
  0x85   : > { %v1173_v44 = vpop.permute.xlu0 %1172 }
  0x86   : > { %v1175_v46 = vunpack.i.h.bf16 %v1173_v44  ;;  %v1174_v47 = vunpack.i.l.bf16 %v1173_v44  ;;  %v1219_v44 = vld [vmem:[%s1525_s5 + $0x38] sm:$0xff]  }
  0x88   : > { %v358_v48 = vsel %vm357_vm3, %v336_v45, %v1174_v47  ;;  %v359_v49 = vsel %vm357_vm3, %v330_v22, %v1175_v46  ;;  %v1212_v22 = vld [vmem:[%s1525_s5] sm:$0xff]  }
  0x89   : > { %v360_v50 = vpack.c.bf16 %v359_v49, %v358_v48 }
  0x8b   : > { %501 = vmatmul.mubr.bf16.vlgmr.msra.gmra.mrb[0].mxu0 %v360_v50 }
  0x8c   : > { %1153 = vmatprep.mubr.msk.bf16.mxu0 %vm1231_vm5, %v1230_v56  ;;  %1138 = vmatpush3.bf16.msra.mxu0 %v1212_v22 }
  0x8d   : > { %1139 = vmatprep.subr.bf16.mxu0 %v1230_v56 }
  0x90   : > { %1140 = vmatpush3.bf16.msra.mxu0 %v1213_v23 }
  0x91   : > { %1141 = vmatprep.subr.bf16.mxu0 %v1230_v56 }
  0x94   : > { %1142 = vmatpush3.bf16.msra.mxu0 %v1214_v24 }
  0x95   : > { %1143 = vmatprep.subr.bf16.mxu0 %v1230_v56 }
  0x98   : > { %1144 = vmatpush3.bf16.msra.mxu0 %v1215_v18 }
  0x99   : > { %1145 = vmatprep.subr.bf16.mxu0 %v1230_v56 }
  0x9c   : > { %1146 = vmatpush3.bf16.msra.mxu0 %v1216_v25 }
  0x9d   : > { %1147 = vmatprep.subr.bf16.mxu0 %v1230_v56 }
  0xa0   : > { %1148 = vmatpush3.bf16.msra.mxu0 %v1217_v26 }
  0xa1   : > { %1149 = vmatprep.subr.bf16.mxu0 %v1230_v56 }
  0xa4   : > { %1150 = vmatpush3.bf16.msra.mxu0 %v1218_v27 }
  0xa5   : > { %1151 = vmatprep.subr.bf16.mxu0 %v1230_v56 }
  0xa8   : > { %1152 = vmatpush3.bf16.msra.mxu0 %v1219_v44 }
 0x15e   : > { %v502_v58 = vpop.f32.mrb[0].mxu0 }
 0x15f   : > { %v503_v59 = vadd.f32 %v1021_v57, %v502_v58  ;;  %v504_v60 = vpop.f32.mrb[1].mxu0 }
 0x160   : > { %v505_v61 = vpop.f32.mrb[2].mxu0 }
 0x161   : > { %v509_v62 = vmax.f32 %v503_v59, 0.0  ;;  %v506_v63 = vadd.f32 %v1021_v57, %v505_v61  ;;  %v507_v0 = vpop.f32.mrb[3].mxu0 }
 0x163   : > { %v510_v1 = vmax.f32 %v506_v63, 0.0  ;;  %v511_v2 = vrot.slane %v509_v62, 7  ;;  %v517_v3 = vrot.slane %v509_v62, 1 }
 0x165   : > { %v512_v5 = vrot.slane %v510_v1, 7  ;;  %v518_v6 = vrot.slane %v510_v1, 1  ;;  %v524_v7 = vpack.c.bf16 %v510_v1, %v509_v62 }
 0x167   : > { %v519_v8 = vsel %vm340_vm0, %v517_v3, %v518_v6  ;;  %v520_v9 = vsel %vm340_vm0, %v518_v6, %v517_v3  ;;  %757 = vmatprep.mubr.bf16.mxu1 %v524_v7  ;;  %v513_v10 = vsel %vm329_vm2, %v511_v2, %v512_v5  ;;  %v514_v11 = vsel %vm329_vm2, %v512_v5, %v511_v2 }
 0x168   : > { %v1064_v13 = vpack.c.bf16 %v520_v9, %v519_v8  ;;  %v1061_v14 = vpack.c.bf16 %v513_v10, %v514_v11 }
 0x16a   : > { %1062 = vmatmul.mubr.msk.bf16.vlgmr.msra.gmra.mrb[0].mxu1 %vm1060_vm7, %v1061_v14 }
 0x16b   : > { %1118 = vmatpush3.bf16.msra.mxu1 %v1204_v12  ;;  %1133 = vmatprep.mubr.msk.bf16.mxu1 %vm1231_vm5, %v1230_v56 }
 0x16c   : > { %1119 = vmatprep.subr.bf16.mxu1 %v1230_v56 }
 0x16f   : > { %1120 = vmatpush3.bf16.msra.mxu1 %v1205_v15 }
 0x170   : > { %1121 = vmatprep.subr.bf16.mxu1 %v1230_v56 }
 0x173   : > { %1122 = vmatpush3.bf16.msra.mxu1 %v1206_v4 }
 0x174   : > { %1123 = vmatprep.subr.bf16.mxu1 %v1230_v56 }
 0x177   : > { %1124 = vmatpush3.bf16.msra.mxu1 %v1207_v16 }
 0x178   : > { %1125 = vmatprep.subr.bf16.mxu1 %v1230_v56 }
 0x17b   : > { %1126 = vmatpush3.bf16.msra.mxu1 %v1208_v17 }
 0x17c   : > { %1127 = vmatprep.subr.bf16.mxu1 %v1230_v56 }
 0x17f   : > { %1128 = vmatpush3.bf16.msra.mxu1 %v1209_v19 }
 0x180   : > { %1129 = vmatprep.subr.bf16.mxu1 %v1230_v56 }
 0x183   : > { %1130 = vmatpush3.bf16.msra.mxu1 %v1210_v20 }
 0x184   : > { %1131 = vmatprep.subr.bf16.mxu1 %v1230_v56 }
 0x187   : > { %1132 = vmatpush3.bf16.msra.mxu1 %v1211_v21 }
 0x18a   : > { %1134 = vmatmul.mubr.msk.bf16.vlgmr.msra.gmra.mrb[4].mxu1 %vm1063_vm8, %v1064_v13 }
 0x23d   : > { %v1093_v28 = vpop.f32.mrb[0].mxu1 }
 0x23e   : > { %v1094_v29 = vpop.f32.mrb[1].mxu1 }
 0x23f   : > { %v1095_v30 = vadd.f32 %v1094_v29, %v1093_v28  ;;  %v1096_v31 = vpop.f32.mrb[2].mxu1 }
 0x240   : > { %v1097_v32 = vpop.f32.mrb[3].mxu1 }
 0x241   : > { %v1098_v33 = vadd.f32 %v1097_v32, %v1096_v31  ;;  %v760_v35 = vadd.f32 %v1095_v30, %v1035_v34 }
 0x243   : > { %v763_v39 = vadd.f32 %v1098_v33, %v1035_v34 }
 0x25d   : > { %v800_v36 = vpop.f32.mrb[4].mxu1 }
 0x25e   : > { %v801_v37 = vadd.f32 %v800_v36, %v760_v35  ;;  %v1135_v38 = vpop.f32.mrb[5].mxu1 }
 0x25f   : > { %v803_v40 = vpop.f32.mrb[6].mxu1 }
 0x260   : > { %v807_v41 = vmax.f32 %v801_v37, 0.0  ;;  %v804_v42 = vadd.f32 %v803_v40, %v763_v39  ;;  %v1136_v43 = vpop.f32.mrb[7].mxu1 }
 0x262   : > { %809 = vst [vmem:[%s287_s28] sm:$0xff] %v807_v41  ;;  %v808_v45 = vmax.f32 %v804_v42, 0.0 }
 0x264   : > { %810 = vst [vmem:[%s287_s28 + $0x8] sm:$0xff] %v808_v45 }
 0x26b   : > { %v811_v46 = vld [vmem:[%s287_s28] ss:$2 sm:$0xff]  ;;  %v1066_v47 = vld [vmem:[%s287_s28 + $0x1] ss:$2 sm:$0xff] }
 0x26c   : > { %v814_v48 = vmax.f32 %v811_v46, %v1066_v47 }
 0x26e   : > { %815 = vrot.lane.b32.xlu0 %v814_v48, %s1233_s26 }
 0x2e0   : > { %v816_v49 = vpop.permute.xlu0 %815 }
 0x2e1   : > { %v817_v50 = vmax.f32 %v814_v48, %v816_v49 }
 0x2e3   : > { %v818_v51 = vpack.c.bf16 %v817_v50, %v817_v50 }
 0x2e5   : > { %1154 = vmatmul.mubr.bf16.vlgmr.msra.gmra.mrb[4].mxu0 %v818_v51 }
 0x3b8   : > { %v917_v52 = vpop.f32.mrb[4].mxu0 }
 0x3b9   : > { %923 = vst.msk [vmem:[%s292_s11] sm:$0xff] %vm357_vm3, %v917_v52  ;;  %v1155_v53 = vpop.f32.mrb[5].mxu0 }
 0x3ba   : > { %v920_v54 = vpop.f32.mrb[6].mxu0 }
 0x3bb   : > { %v1156_v55 = vpop.f32.mrb[7].mxu0 }
 0x3bc PF: > { %s18_s24 = sadd.s32 1, %s1226_s24  }
 0x3bd   : > { %p15_p5 = scmp.ge.s32.totalorder %s18_s24, 4  }
 0x3bf   :  { %17 = sbr.rel (!%p15_p5) target bundleno = 1 (0x1), region = 87 }

</bundles_post_ra>
